<compile_context>
chip_gen: v5e
topology: v5e:2x2
jax: 0.10.0
libtpu: 0.0.40
codegen_flags: <defaults>
</compile_context>

<pallas_src>
import functools

import jax
import jax.numpy as jnp
from jax.experimental import pallas as pl
from jax.experimental.pallas import tpu as pltpu


LANE = 128
_MAX_FC_TILE_BYTES = 8 << 20     # per-tile w_fc VMEM budget (double-buffered
                                 # still far below v7x's 64 MiB VMEM)


# ---------------------------------------------------------------------------
# Kernel 1: RNN recurrence  ->  h_n  (B, H)
# ---------------------------------------------------------------------------
def _rnn_kernel(x_ref, wih_ref, whh_ref, brnn_ref, h_ref):
    """Serial tanh-RNN recurrence with the input projection hoisted.

    x_ref   : (T*B, I)  time-major input, flattened over (T, B)
    wih_ref : (I, H)    input->hidden weight (transposed)
    whh_ref : (H, H)    hidden->hidden weight (transposed)
    brnn_ref: (1, H)    fused bias b_ih + b_hh
    h_ref   : (B, H)    output: final hidden state h_n
    """
    TB = x_ref.shape[0]
    B, H = h_ref.shape
    T = TB // B

    # Hoisted input projection + fused bias: ONE MXU matmul for all T steps.
    pre = (jnp.dot(x_ref[...], wih_ref[...],
                   preferred_element_type=jnp.float32)
           + brnn_ref[...])                                   # (T*B, H)

    whh = whh_ref[...]
    h = jnp.zeros((B, H), dtype=jnp.float32)
    # Full static unroll: T is a compile-time constant, all slices static.
    # Per-step critical path is just one tiny matmul + tanh (EUP).
    for t in range(T):
        h = jnp.tanh(pre[t * B:(t + 1) * B, :]
                     + jnp.dot(h, whh, preferred_element_type=jnp.float32))
    h_ref[...] = h


# ---------------------------------------------------------------------------
# Kernel 2: Linear layer, tiled over the (lane-dense) output dim O
# ---------------------------------------------------------------------------
def _fc_kernel(h_ref, wfc_ref, bfc_ref, out_ref):
    """out[:, j-th tile] = h_n @ w_fc_tile + b_fc_tile.

    h_ref   : (B, H)     final hidden state (same block for every grid step)
    wfc_ref : (H, tn)    fc weight tile (transposed; bf16 by default)
    bfc_ref : (1, tn)    fc bias tile (f32)
    out_ref : (B, tn)    output tile (last tile may be ragged -> masked store)
    """
    acc = jnp.dot(h_ref[...].astype(wfc_ref.dtype), wfc_ref[...],
                  preferred_element_type=jnp.float32)
    out_ref[...] = (acc + bfc_ref[...]).astype(out_ref.dtype)


# ---------------------------------------------------------------------------
# One-time weight layout prep (call OUTSIDE the jitted forward)
# ---------------------------------------------------------------------------
def _fc_tiling(H, O, itemsize):
    """Even (>=2, for v7x's two TensorCores), lane-dense tiling of O with
    minimal padding and as few grid steps as the VMEM budget allows."""
    n_tiles = 1 if O <= LANE else 2
    while True:
        unit = n_tiles * LANE
        o_pad = -(-O // unit) * unit
        tn = o_pad // n_tiles
        if tn == LANE or H * tn * itemsize <= _MAX_FC_TILE_BYTES:
            return tn, o_pad
        n_tiles *= 2          # stays even -> balanced megacore split


def prepare_params(params, output_channels, output_seq_len,
                   fc_weight_dtype=jnp.bfloat16):
    """Pre-transpose / cast / pad all weights ONCE (not per forward call)."""
    H = params["w_hh"].shape[0]
    O = output_channels * output_seq_len
    tn, o_pad = _fc_tiling(H, O, jnp.dtype(fc_weight_dtype).itemsize)

    wfc_t = params["w_fc"].T.astype(fc_weight_dtype)          # (H, O)
    b_fc = params["b_fc"].reshape(1, O).astype(jnp.float32)   # (1, O)
    if o_pad != O:
        wfc_t = jnp.pad(wfc_t, ((0, 0), (0, o_pad - O)))
        b_fc = jnp.pad(b_fc, ((0, 0), (0, o_pad - O)))

    prepped = {
        "wih_t": params["w_ih"].T.astype(jnp.float32),                # (I, H)
        "whh_t": params["w_hh"].T.astype(jnp.float32),                # (H, H)
        "b_rnn": (params["b_ih"] + params["b_hh"])
                 .reshape(1, H).astype(jnp.float32),                  # (1, H)
        "wfc_t": wfc_t,                                               # (H, o_pad)
        "b_fc": b_fc,                                                 # (1, o_pad)
    }
    return prepped, tn


# ---------------------------------------------------------------------------
# Forward (jit-able; consumes pre-laid-out weights)
# ---------------------------------------------------------------------------
def discriminator_forward(x, prepped, *, output_channels, output_seq_len,
                          fc_tile):
    """x: (B, T, I) float32, batch_first like the PyTorch module."""
    B, T, I = x.shape
    H = prepped["whh_t"].shape[0]
    O = output_channels * output_seq_len
    o_pad = prepped["wfc_t"].shape[1]
    tn = fc_tile

    # ---- layout glue (pure JAX, input only): time-major + flattened --------
    x2d = jnp.transpose(x, (1, 0, 2)).reshape(T * B, I)       # (T*B, I)

    # ---- recurrence kernel: everything fits in VMEM, no grid needed --------
    h_n = pl.pallas_call(
        _rnn_kernel,
        out_shape=jax.ShapeDtypeStruct((B, H), jnp.float32),
        in_specs=[pl.BlockSpec(memory_space=pltpu.MemorySpace.VMEM)] * 4,
        out_specs=pl.BlockSpec(memory_space=pltpu.MemorySpace.VMEM),
    )(x2d, prepped["wih_t"], prepped["whh_t"], prepped["b_rnn"])

    # ---- fc kernel: unpadded (B, O) output, even parallel grid over O ------
    out = pl.pallas_call(
        _fc_kernel,
        out_shape=jax.ShapeDtypeStruct((B, O), jnp.float32),
        grid=(o_pad // tn,),
        in_specs=[
            pl.BlockSpec((B, H), lambda j: (0, 0)),    # h_n resident
            pl.BlockSpec((H, tn), lambda j: (0, j)),   # fc weight tile
            pl.BlockSpec((1, tn), lambda j: (0, j)),   # fc bias tile
        ],
        out_specs=pl.BlockSpec((B, tn), lambda j: (0, j)),
        compiler_params=pltpu.CompilerParams(
            dimension_semantics=("parallel",),
        ),
    )(h_n, prepped["wfc_t"], prepped["b_fc"])

    return out.reshape(B, output_channels, output_seq_len)


# ---------------------------------------------------------------------------
# Parameters / reference
# ---------------------------------------------------------------------------
def init_params(key, input_size, hidden_size, output_channels, output_seq_len):
    """Deterministic synthetic parameters matching nn.RNN / nn.Linear shapes."""
    O = output_channels * output_seq_len
    k = jax.random.split(key, 6)
    s_rnn = 1.0 / jnp.sqrt(hidden_size)
    s_fc = 1.0 / jnp.sqrt(hidden_size)
    return {
        "w_ih": jax.random.uniform(k[0], (hidden_size, input_size),
                                   jnp.float32, -s_rnn, s_rnn),
        "w_hh": jax.random.uniform(k[1], (hidden_size, hidden_size),
                                   jnp.float32, -s_rnn, s_rnn),
        "b_ih": jax.random.uniform(k[2], (hidden_size,),
                                   jnp.float32, -s_rnn, s_rnn),
        "b_hh": jax.random.uniform(k[3], (hidden_size,),
                                   jnp.float32, -s_rnn, s_rnn),
        "w_fc": jax.random.uniform(k[4], (O, hidden_size),
                                   jnp.float32, -s_fc, s_fc),
        "b_fc": jax.random.uniform(k[5], (O,),
                                   jnp.float32, -s_fc, s_fc),
    }


def _reference_forward(x, params, output_channels, output_seq_len):
    """Pure-JAX reference mirroring the PyTorch forward."""
    B, T, I = x.shape
    H = params["w_hh"].shape[0]
    h = jnp.zeros((B, H), jnp.float32)
    for t in range(T):
        h = jnp.tanh(x[:, t, :] @ params["w_ih"].T + params["b_ih"]
                     + h @ params["w_hh"].T + params["b_hh"])
    out = h @ params["w_fc"].T + params["b_fc"]
    return out.reshape(B, output_channels, output_seq_len)


if __name__ == "__main__":
    # Small shapes consistent with the module (num_layers=1, bidirectional=False).
    B, T = 2, 8                 # batch, sequence length
    input_size = 4
    hidden_size = 32
    output_channels = 7
    output_seq_len = 24         # scaled down from 3000 for a quick run

    key = jax.random.PRNGKey(0)
    kx, kp = jax.random.split(key)
    x = jax.random.normal(kx, (B, T, input_size), jnp.float32)
    params = init_params(kp, input_size, hidden_size,
                         output_channels, output_seq_len)

    ref = _reference_forward(x, params, output_channels, output_seq_len)

    # --- f32 validation mode: exact parity with the f32 reference -----------
    prepped32, tn32 = prepare_params(params, output_channels, output_seq_len,
                                     fc_weight_dtype=jnp.float32)
    fwd32 = jax.jit(functools.partial(discriminator_forward,
                                      output_channels=output_channels,
                                      output_seq_len=output_seq_len,
                                      fc_tile=tn32))
    out32 = fwd32(x, prepped32)
    jax.block_until_ready(out32)
    assert out32.shape == (B, output_channels, output_seq_len)
    assert jnp.allclose(out32, ref, atol=1e-5, rtol=1e-5)

    # --- default (production) mode: fc weight streamed as bf16 --------------
    prepped, tn = prepare_params(params, output_channels, output_seq_len)
    fwd = jax.jit(functools.partial(discriminator_forward,
                                    output_channels=output_channels,
                                    output_seq_len=output_seq_len,
                                    fc_tile=tn))
    out = fwd(x, prepped)
    jax.block_until_ready(out)
    assert out.shape == (B, output_channels, output_seq_len)
    assert jnp.allclose(out, ref, atol=5e-2, rtol=5e-2)   # bf16 weight stream

    print("KERNEL_OK")
</pallas_src>

<mosaic_0001>
module attributes {stable_mosaic.version = 11 : i64} {
  func.func @_rnn_kernel(%arg0: memref<16x4xf32, #tpu.memory_space<vmem>>, %arg1: memref<4x32xf32, #tpu.memory_space<vmem>>, %arg2: memref<32x32xf32, #tpu.memory_space<vmem>>, %arg3: memref<1x32xf32, #tpu.memory_space<vmem>>, %arg4: memref<2x32xf32, #tpu.memory_space<vmem>>) attributes {dimension_semantics = [], scalar_prefetch = 0 : i64, scratch_operands = 0 : i64, tpu.core_type = #tpu.core_type<tc>} {
    %c0 = arith.constant 0 : index
    %c0_0 = arith.constant 0 : index
    %0 = vector.load %arg0[%c0, %c0_0] : memref<16x4xf32, #tpu.memory_space<vmem>>, vector<16x4xf32>
    %c0_1 = arith.constant 0 : index
    %c0_2 = arith.constant 0 : index
    %1 = vector.load %arg1[%c0_1, %c0_2] : memref<4x32xf32, #tpu.memory_space<vmem>>, vector<4x32xf32>
    %cst = arith.constant dense<0.000000e+00> : vector<16x32xf32>
    %2 = tpu.matmul %0, %1, %cst {dimension_numbers = #tpu.dot_dimension_numbers<[1], [0], [0], [1], [0, 0, 1, 1], [], []>} : vector<16x4xf32>, vector<4x32xf32>, vector<16x32xf32> -> vector<16x32xf32>
    %c0_3 = arith.constant 0 : index
    %c0_4 = arith.constant 0 : index
    %3 = vector.load %arg3[%c0_3, %c0_4] : memref<1x32xf32, #tpu.memory_space<vmem>>, vector<1x32xf32>
    %4 = vector.broadcast %3 : vector<1x32xf32> to vector<16x32xf32>
    %5 = arith.addf %2, %4 : vector<16x32xf32>
    %c0_5 = arith.constant 0 : index
    %c0_6 = arith.constant 0 : index
    %6 = vector.load %arg2[%c0_5, %c0_6] : memref<32x32xf32, #tpu.memory_space<vmem>>, vector<32x32xf32>
    %cst_7 = arith.constant 0.000000e+00 : f32
    %7 = vector.broadcast %cst_7 : f32 to vector<2x32xf32>
    %8 = vector.extract_strided_slice %5 {offsets = [0, 0], sizes = [2, 32], strides = [1, 1]} : vector<16x32xf32> to vector<2x32xf32>
    %cst_8 = arith.constant dense<0.000000e+00> : vector<2x32xf32>
    %9 = tpu.matmul %7, %6, %cst_8 {dimension_numbers = #tpu.dot_dimension_numbers<[1], [0], [0], [1], [0, 0, 1, 1], [], []>} : vector<2x32xf32>, vector<32x32xf32>, vector<2x32xf32> -> vector<2x32xf32>
    %10 = arith.addf %8, %9 : vector<2x32xf32>
    %11 = math.tanh %10 : vector<2x32xf32>
    %12 = vector.extract_strided_slice %5 {offsets = [2, 0], sizes = [2, 32], strides = [1, 1]} : vector<16x32xf32> to vector<2x32xf32>
    %cst_9 = arith.constant dense<0.000000e+00> : vector<2x32xf32>
    %13 = tpu.matmul %11, %6, %cst_9 {dimension_numbers = #tpu.dot_dimension_numbers<[1], [0], [0], [1], [0, 0, 1, 1], [], []>} : vector<2x32xf32>, vector<32x32xf32>, vector<2x32xf32> -> vector<2x32xf32>
    %14 = arith.addf %12, %13 : vector<2x32xf32>
    %15 = math.tanh %14 : vector<2x32xf32>
    %16 = vector.extract_strided_slice %5 {offsets = [4, 0], sizes = [2, 32], strides = [1, 1]} : vector<16x32xf32> to vector<2x32xf32>
    %cst_10 = arith.constant dense<0.000000e+00> : vector<2x32xf32>
    %17 = tpu.matmul %15, %6, %cst_10 {dimension_numbers = #tpu.dot_dimension_numbers<[1], [0], [0], [1], [0, 0, 1, 1], [], []>} : vector<2x32xf32>, vector<32x32xf32>, vector<2x32xf32> -> vector<2x32xf32>
    %18 = arith.addf %16, %17 : vector<2x32xf32>
    %19 = math.tanh %18 : vector<2x32xf32>
    %20 = vector.extract_strided_slice %5 {offsets = [6, 0], sizes = [2, 32], strides = [1, 1]} : vector<16x32xf32> to vector<2x32xf32>
    %cst_11 = arith.constant dense<0.000000e+00> : vector<2x32xf32>
    %21 = tpu.matmul %19, %6, %cst_11 {dimension_numbers = #tpu.dot_dimension_numbers<[1], [0], [0], [1], [0, 0, 1, 1], [], []>} : vector<2x32xf32>, vector<32x32xf32>, vector<2x32xf32> -> vector<2x32xf32>
    %22 = arith.addf %20, %21 : vector<2x32xf32>
    %23 = math.tanh %22 : vector<2x32xf32>
    %24 = vector.extract_strided_slice %5 {offsets = [8, 0], sizes = [2, 32], strides = [1, 1]} : vector<16x32xf32> to vector<2x32xf32>
    %cst_12 = arith.constant dense<0.000000e+00> : vector<2x32xf32>
    %25 = tpu.matmul %23, %6, %cst_12 {dimension_numbers = #tpu.dot_dimension_numbers<[1], [0], [0], [1], [0, 0, 1, 1], [], []>} : vector<2x32xf32>, vector<32x32xf32>, vector<2x32xf32> -> vector<2x32xf32>
    %26 = arith.addf %24, %25 : vector<2x32xf32>
    %27 = math.tanh %26 : vector<2x32xf32>
    %28 = vector.extract_strided_slice %5 {offsets = [10, 0], sizes = [2, 32], strides = [1, 1]} : vector<16x32xf32> to vector<2x32xf32>
    %cst_13 = arith.constant dense<0.000000e+00> : vector<2x32xf32>
    %29 = tpu.matmul %27, %6, %cst_13 {dimension_numbers = #tpu.dot_dimension_numbers<[1], [0], [0], [1], [0, 0, 1, 1], [], []>} : vector<2x32xf32>, vector<32x32xf32>, vector<2x32xf32> -> vector<2x32xf32>
    %30 = arith.addf %28, %29 : vector<2x32xf32>
    %31 = math.tanh %30 : vector<2x32xf32>
    %32 = vector.extract_strided_slice %5 {offsets = [12, 0], sizes = [2, 32], strides = [1, 1]} : vector<16x32xf32> to vector<2x32xf32>
    %cst_14 = arith.constant dense<0.000000e+00> : vector<2x32xf32>
    %33 = tpu.matmul %31, %6, %cst_14 {dimension_numbers = #tpu.dot_dimension_numbers<[1], [0], [0], [1], [0, 0, 1, 1], [], []>} : vector<2x32xf32>, vector<32x32xf32>, vector<2x32xf32> -> vector<2x32xf32>
    %34 = arith.addf %32, %33 : vector<2x32xf32>
    %35 = math.tanh %34 : vector<2x32xf32>
    %36 = vector.extract_strided_slice %5 {offsets = [14, 0], sizes = [2, 32], strides = [1, 1]} : vector<16x32xf32> to vector<2x32xf32>
    %cst_15 = arith.constant dense<0.000000e+00> : vector<2x32xf32>
    %37 = tpu.matmul %35, %6, %cst_15 {dimension_numbers = #tpu.dot_dimension_numbers<[1], [0], [0], [1], [0, 0, 1, 1], [], []>} : vector<2x32xf32>, vector<32x32xf32>, vector<2x32xf32> -> vector<2x32xf32>
    %38 = arith.addf %36, %37 : vector<2x32xf32>
    %39 = math.tanh %38 : vector<2x32xf32>
    %c0_16 = arith.constant 0 : index
    %c0_17 = arith.constant 0 : index
    %40 = vector.load %arg4[%c0_16, %c0_17] : memref<2x32xf32, #tpu.memory_space<vmem>>, vector<2x32xf32>
    tpu.vector_store %arg4[%c0_16, %c0_17], %39 {strides = array<i32>} : memref<2x32xf32, #tpu.memory_space<vmem>>, vector<2x32xf32>,
    return
  }
}

module attributes {stable_mosaic.version = 11 : i64} {
  func.func @_fc_kernel(%arg0: i32, %arg1: memref<2x32xf32, #tpu.memory_space<vmem>>, %arg2: memref<32x128xf32, #tpu.memory_space<vmem>>, %arg3: memref<1x128xf32, #tpu.memory_space<vmem>>, %arg4: memref<2x128xf32, #tpu.memory_space<vmem>>) attributes {dimension_semantics = [#tpu.dimension_semantics<parallel>], iteration_bounds = array<i64: 2>, scalar_prefetch = 0 : i64, scratch_operands = 0 : i64, tpu.core_type = #tpu.core_type<tc>, window_params = [{pipeline_mode = #tpu.pipeline_mode<synchronous>, transform_indices = @transform_0, window_bounds = array<i64: 2, 32>}, {transform_indices = @transform_1, window_bounds = array<i64: 32, 128>}, {transform_indices = @transform_2, window_bounds = array<i64: 1, 128>}, {transform_indices = @transform_3, window_bounds = array<i64: 2, 128>}]} {
    %c0 = arith.constant 0 : index
    %c0_0 = arith.constant 0 : index
    %0 = vector.load %arg1[%c0, %c0_0] : memref<2x32xf32, #tpu.memory_space<vmem>>, vector<2x32xf32>
    %c0_1 = arith.constant 0 : index
    %c0_2 = arith.constant 0 : index
    %1 = vector.load %arg2[%c0_1, %c0_2] : memref<32x128xf32, #tpu.memory_space<vmem>>, vector<32x128xf32>
    %cst = arith.constant dense<0.000000e+00> : vector<2x128xf32>
    %2 = tpu.matmul %0, %1, %cst {dimension_numbers = #tpu.dot_dimension_numbers<[1], [0], [0], [1], [0, 0, 1, 1], [], []>} : vector<2x32xf32>, vector<32x128xf32>, vector<2x128xf32> -> vector<2x128xf32>
    %c0_3 = arith.constant 0 : index
    %c0_4 = arith.constant 0 : index
    %3 = vector.load %arg3[%c0_3, %c0_4] : memref<1x128xf32, #tpu.memory_space<vmem>>, vector<1x128xf32>
    %4 = vector.broadcast %3 : vector<1x128xf32> to vector<2x128xf32>
    %5 = arith.addf %2, %4 : vector<2x128xf32>
    %c0_5 = arith.constant 0 : index
    %c0_6 = arith.constant 0 : index
    %6 = vector.load %arg4[%c0_5, %c0_6] : memref<2x128xf32, #tpu.memory_space<vmem>>, vector<2x128xf32>
    tpu.vector_store %arg4[%c0_5, %c0_6], %5 {strides = array<i32>} : memref<2x128xf32, #tpu.memory_space<vmem>>, vector<2x128xf32>,
    return
  }
  func.func @transform_0(%arg0: i32) -> (i32, i32) {
    %c0_i32 = arith.constant 0 : i32
    %c0_i32_0 = arith.constant 0 : i32
    %c0_i32_1 = arith.constant 0 : i32
    return %c0_i32, %c0_i32_0 : i32, i32
  }
  func.func @transform_1(%arg0: i32) -> (i32, i32) {
    %c0_i32 = arith.constant 0 : i32
    %c0_i32_0 = arith.constant 0 : i32
    return %c0_i32, %arg0 : i32, i32
  }
  func.func @transform_2(%arg0: i32) -> (i32, i32) {
    %c0_i32 = arith.constant 0 : i32
    %c0_i32_0 = arith.constant 0 : i32
    return %c0_i32, %arg0 : i32, i32
  }
  func.func @transform_3(%arg0: i32) -> (i32, i32) {
    %c0_i32 = arith.constant 0 : i32
    %c0_i32_0 = arith.constant 0 : i32
    return %c0_i32, %arg0 : i32, i32
  }
}

</mosaic_0001>

<bundles_post_ra>
// kernel: discriminator_forward.3
= control target key start
LH: loop header
LB: loop body
LE: loop exit
PB: predicated region body
PF: predicated region fallthrough
CT: control target
= control target key end

     0   :  { %8 = vsyncpa [#allocation3], 0  ;;  %s551_s0 = inlined_call_operand.vmem [shape: f32[2,32], index: 0, kind: input, shape index: {}]   ;;  %s552_s1 = inlined_call_operand.hbm [shape: f32[32,256], index: 1, kind: input, shape index: {}]   ;;  %s553_s2 = inlined_call_operand.vmem [shape: f32[1,256], index: 2, kind: input, shape index: {}]   ;;  %s554_s3 = inlined_call_operand.vmem [shape: f32[2,168], index: 3, kind: output, shape index: {}]  }
   0x1   :  { %10 = vsyncpa [#allocation3 + $0x1], 0  ;;  %s455_s12 = smov 0   ;;  %s457_s13 = smov 0  }
   0x2   :  { %s459_s14 = smov 0   ;;  %s461_s15 = smov 0  }
   0x3 LB: > { %s474_s16 = sadd.s32 4294967295, %s430_s15   ;;  %s477_s17 = sadd.s32 1, %s430_s15   ;;  %s430_s15 = sphi %s461_s15, %s561_s15   ;;  %s426_s14 = sphi %s459_s14, %s560_s14   ;;  %s422_s13 = sphi %s457_s13, %s559_s13   ;;  %s418_s12 = sphi %s455_s12, %s558_s12  }
   0x4   : > { %s41_s18 = ssub.s32 %s430_s15, %s477_s17  ;;  %s44_s19 = sadd.s32 1, %s426_s14 }
   0x5   : > { %p42_p0 = scmp.eq.s32.totalorder %s41_s18, 0  ;;  %p51_p1 = scmp.ne.s32.totalorder %s426_s14, %s422_s13 }
   0x6   : > { %p52_p2 = scmp.eq.s32.totalorder %s430_s15, 0  ;;  %p57_p3 = scmp.ne.s32.totalorder %s422_s13, %s418_s12 }
   0x7   : > { %s487_s20 = scalar_select %p42_p0, %s426_s14, %s44_s19  }
   0x8   : > { %p489_p4 = por %p52_p2, %p51_p1  ;;  %p58_p5 = scmp.eq.s32.totalorder %s474_s16, 0 }
   0x9   : > { %p329_p6 = scmp.lt.s32.totalorder %s430_s15, 2  ;;  %s136_s23 = sand.u32 1, %s426_s14  }
   0xa   : > { %p495_p7 = por %p58_p5, %p57_p3  ;;  %s315_s24 = sshll.u32 %s136_s23, 5 }
   0xb   : > { %s316_s25 = sshll.u32 %s430_s15, 3  ;;  %s140_s29 = scalar_lea.vmem [#allocation2], %s315_s24 }
   0xc   : > { %s144_s28 = scalar_lea.hbm %s552_s1, %s316_s25  ;;  %s147_s30 = sshll.u32 %s140_s29, 4  ;;  %s148_s30 = int_to_ptr.vmem [resolvable:$true] %s147_s30 }
   0xd   : > { %s145_s4 = sshll.u32 %s144_s28, 4  ;;  %p506_p8 = pnand %p329_p6, %p489_p4  ;;  %s146_s4 = int_to_ptr.hbm [resolvable:$true] %s145_s4 }
   0xe   : > { %s137_s6 = scalar_lea.sflag [#allocation3], %s136_s23  ;;  %s366_s7 = sshra.s32 %s146_s4, 4  ;;  %s367_s7 = int_to_ptr.hbm [resolvable:$true] %s366_s7 }
   0xf   : > { %s368_s8 = scalar_lea.hbm %s367_s7, 32  ;;  %p370_p10 = pneg %p506_p8 }
  0x10   : > { %p369_p9 = scmp.ne.s32.totalorder %s367_s7, %s368_s8  ;;  %s373_s11 = scalar_lea.hbm %s552_s1, 64 }
  0x11   : > { %p374_p13 = scmp.lt.s32.totalorder %s367_s7, %s552_s1  ;;  %p375_p0 = scmp.lt.s32.totalorder %s373_s11, %s368_s8 }
  0x12   : > { %p371_p11 = pnand %p370_p10, %p369_p9 }
  0x13   : > { %p376_p1 = por %p375_p0, %p374_p13 }
  0x14   : > { %p372_p12 = pneg %p371_p11 }
  0x16   : > { %p377_p2 = pnand %p376_p1, %p372_p12 }
  0x18   : > { %380 = shalt.err (!%p377_p2)
}
  0x19   : > { %s432_s19 = smov 256   ;;  %s433_s21 = smov 128  }
  0x1a   : > { %s434_s23 = smov 8   ;;  %p317_p3 = scmp.ge.s32.totalorder %s430_s15, 1 }
  0x1b   : > { %328 = dma.hbm_to_vmem [thread:$0]  (!%p506_p8), %s146_s4, 512, %s148_s30, %s137_s6, %s432_s19, %s433_s21, %s434_s23  }
  0x1c   : > { %p161_p4 = scmp.lt.s32.totalorder %s430_s15, 3 }
  0x1e   : > { %p162_p5 = pnand %p317_p3, %p161_p4 }
  0x1f   : > { %s167_s24 = sand.u32 (!%p162_p5), 1, %s422_s13  }
  0x20   : > { %165 = sbr.rel (%p162_p5) target bundleno = 175 (0xaf), region = 32  ;;  %s318_s25 = sshll.u32 (!%p162_p5), %s167_s24, 5 }
  0x21   : > { %s168_s26 = scalar_lea.sflag (!%p162_p5), [#allocation3], %s167_s24  ;;  %s171_s27 = scalar_lea.vmem (!%p162_p5), [#allocation2], %s318_s25 }
  0x25   : > { %413 = dma.done.wait (%p495_p7), %s168_s26, 512  }
  0x26   : > { %415 = vsyncadd (%p495_p7), %s168_s26, 4294966784  ;;  %p197_p6 = scmp.lt.s32.totalorder %s474_s16, 1  ;;  %v208_v0 = vld [vmem:[%s171_s27 + $0x18] sm:$0xff]  ;;  %v207_v1 = vld [vmem:[%s171_s27 + $0x10] sm:$0xff]  ;;  %vm213_vm0 = vcmask 261120  }
  0x27   : > { %229 = vmatpush.msra.mxu0 %v208_v0  ;;  %v206_v2 = vld [vmem:[%s171_s27 + $0x8] sm:$0xff]  ;;  %v205_v3 = vld [vmem:[%s171_s27] sm:$0xff] }
  0x28   : > { %s563_s16 = smov (!%p197_p6, %s474_s16), 1  ;;  %v204_v4 = vld [vmem:[%s551_s0] sm:$0x3] }
  0x29   : > { %s199_s29 = scalar_lea.vmem %s553_s2, %s563_s16  ;;  %230 = vmatpush.msra.mxu0 %v207_v1  ;;  %s319_s22 = sshll.u32 %s563_s16, 1 }
  0x2a   : > { %v365_v5 = vld [vmem:[%s199_s29] ss:$0 sm:$0xff]  ;;  %s203_s7 = scalar_lea.vmem %s554_s3, %s319_s22 }
  0x2b   : > { %231 = vmatpush.msra.mxu0 %v206_v2 }
  0x2d   : > { %232 = vmatpush.msra.mxu0 %v205_v3 }
  0x2e   : > { %320 = vmatmul.msk.f32.vlgmr.msra.gmra.mxu0 %vm213_vm0, %v204_v4 }
  0xab   : > { %v234_v6 = vpop.f32.mrf.mxu0 }
  0xac   : > { %v235_v7 = vadd.f32 %v365_v5, %v234_v6 }
  0xae   : > { %237 = vst [vmem:[%s203_s7] sm:$0x3] %v235_v7 }
  0xaf PF: > { %p13_p7 = scmp.ge.s32.totalorder %s477_s17, 4   ;;  %s558_s12 = smov %s422_s13 }
  0xb0   : > { %s559_s13 = smov %s426_s14  ;;  %s560_s14 = smov %s487_s20 }
  0xb1   : > { %s561_s15 = smov %s477_s17  ;;  %15 = sbr.rel (!%p13_p7) target bundleno = 3 (0x3), region = 75 }
  0xb6   :  { %257 = vsyncpa [#allocation3], 1 }
  0xb7   :  { %259 = vsyncpa [#allocation3 + $0x1], 1 }

// kernel: discriminator_forward.2
= control target key start
LH: loop header
LB: loop body
LE: loop exit
PB: predicated region body
PF: predicated region fallthrough
CT: control target
= control target key end

     0   :  { %9 = vsyncpa [#allocation3], 0  ;;  %s366_s18 = smov [#allocation2]   ;;  %s367_s20 = smov 128   ;;  %s422_s0 = inlined_call_operand.vmem [shape: f32[16,4], index: 0, kind: input, shape index: {}]   ;;  %s423_s1 = inlined_call_operand.vmem [shape: f32[4,32], index: 1, kind: input, shape index: {}]   ;;  %s424_s2 = inlined_call_operand.hbm [shape: f32[32,32], index: 2, kind: input, shape index: {}]   ;;  %s425_s3 = inlined_call_operand.vmem [shape: f32[1,32], index: 3, kind: input, shape index: {}]   ;;  %s426_s4 = inlined_call_operand.vmem [shape: f32[2,32], index: 4, kind: output, shape index: {}]  }
   0x1   :  { %s18_s17 = sshll.u32 %s424_s2, 4  ;;  %s20_s19 = sshll.u32 %s366_s18, 4  ;;  %s19_s17 = int_to_ptr.hbm [resolvable:$true] %s18_s17  ;;  %s21_s19 = int_to_ptr.vmem [resolvable:$true] %s20_s19 }
   0x2   :  { %s368_s21 = smov 8  }
   0x3   :  { %26 = dma.hbm_to_vmem [thread:$0]  %s19_s17, 512, %s21_s19, [#allocation3], %s367_s20, %s367_s20, %s368_s21  }
   0x4   :  { %364 = dma.done.wait [#allocation3], 512  }
   0x5   :  { %365 = vsyncadd [#allocation3], 4294966784  ;;  %vm47_vm0 = vcmask 1043456   ;;  %vm40_vm1 = vcmask 31744   ;;  %v77_v0 = vld [vmem:[#allocation2 + $0x18] sm:$0xff]  ;;  %v76_v1 = vld [vmem:[#allocation2 + $0x10] sm:$0xff] }
   0x6   :  { %v35_v2 = vld [vmem:[%s423_s1] sm:$0xf]  ;;  %94 = vmatpush.msra.mxu1 %v77_v0  ;;  %v75_v4 = vld [vmem:[#allocation2 + $0x8] sm:$0xff]  ;;  %119 = vmatpush.msra.mxu2 %v77_v0  ;;  %v369_v6 = vmov 0.0   ;;  %vm78_vm2 = vcmask 261120   ;;  %vm302_vm3 = vcmask 261126  }
   0x7   :  { %309 = vmatpush.msk.msra.mxu0 %vm47_vm0, %v35_v2  ;;  %v33_v3 = vld [vmem:[%s422_s0] sm:$0xff]  ;;  %148 = vmatpush.msra.mxu3 %v77_v0  ;;  %v34_v23 = vld [vmem:[%s422_s0 + $0x8] sm:$0xff] }
   0x8   :  { %310 = vmatmul.msk.f32.vlgmr.msra.gmra.mxu0 %vm40_vm1, %v33_v3  ;;  %95 = vmatpush.msra.mxu1 %v76_v1  ;;  %v74_v5 = vld [vmem:[#allocation2] sm:$0xff] }
   0x9   :  { %120 = vmatpush.msra.mxu2 %v76_v1  ;;  %260 = vmatpush.msrb.mxu0 %v77_v0  ;;  %v323_v7 = vld [vmem:[%s425_s3] ss:$0 sm:$0xff] }
   0xa   :  { %96 = vmatpush.msra.mxu1 %v75_v4  ;;  %149 = vmatpush.msra.mxu3 %v76_v1 }
   0xb   :  { %121 = vmatpush.msra.mxu2 %v75_v4  ;;  %261 = vmatpush.msrb.mxu0 %v76_v1 }
   0xc   :  { %97 = vmatpush.msra.mxu1 %v74_v5  ;;  %150 = vmatpush.msra.mxu3 %v75_v4 }
   0xd   :  { %98 = vmatmul.f32.vlgmr.msra.gmra.mxu1 %v369_v6  ;;  %122 = vmatpush.msra.mxu2 %v74_v5 }
   0xe   :  { %151 = vmatpush.msra.mxu3 %v74_v5  ;;  %177 = vmatpush.msrb.mxu1 %v77_v0 }
   0xf   :  { %206 = vmatpush.msrb.mxu2 %v77_v0  ;;  %262 = vmatpush.msrb.mxu0 %v75_v4 }
  0x10   :  { %231 = vmatpush.msrb.mxu3 %v77_v0  ;;  %178 = vmatpush.msrb.mxu1 %v76_v1 }
  0x11   :  { %207 = vmatpush.msrb.mxu2 %v76_v1  ;;  %263 = vmatpush.msrb.mxu0 %v74_v5 }
  0x12   :  { %232 = vmatpush.msrb.mxu3 %v76_v1  ;;  %179 = vmatpush.msrb.mxu1 %v75_v4 }
  0x13   :  { %208 = vmatpush.msrb.mxu2 %v75_v4  ;;  %311 = vmatmul.msk.f32.gmra.mxu0 %vm40_vm1, %v34_v23 }
  0x14   :  { %233 = vmatpush.msrb.mxu3 %v75_v4  ;;  %180 = vmatpush.msrb.mxu1 %v74_v5 }
  0x15   :  { %209 = vmatpush.msrb.mxu2 %v74_v5 }
  0x16   :  { %234 = vmatpush.msrb.mxu3 %v74_v5  ;;  %289 = vmatpush.msra.mxu1 %v77_v0 }
  0x18   :  { %290 = vmatpush.msra.mxu1 %v76_v1 }
  0x1a   :  { %291 = vmatpush.msra.mxu1 %v75_v4 }
  0x1c   :  { %292 = vmatpush.msra.mxu1 %v74_v5 }
  0x85   :  { %v68_v8 = vpop.f32.mrf.mxu0 }
  0x86   :  { %v69_v9 = vadd.f32 %v323_v7, %v68_v8 }
  0x8a   :  { %v99_v10 = vpop.f32.mrf.mxu1 }
  0x8b   :  { %v102_v11 = vadd.f32 %v99_v10, %v69_v9 }
  0x8d   :  { %324 = vtanh.f32 %v102_v11 }
  0x90   :  { %v71_v29 = vpop.f32.mrf.mxu0 }
  0x91   :  { %v72_v30 = vadd.f32 %v323_v7, %v71_v29 }
  0x93   :  { %v325_v12 = vpop.eup %324 }
  0x94   :  { %312 = vmatmul.msk.f32.vlgmr.msra.gmra.mxu2 %vm78_vm2, %v325_v12 }
 0x117   :  { %v124_v13 = vpop.f32.mrf.mxu2 }
 0x118   :  { %v128_v14 = vrot.slane %v124_v13, 6 }
 0x11a   :  { %v130_v15 = vadd.f32 %v128_v14, %v69_v9 }
 0x11c   :  { %326 = vtanh.f32 %v130_v15 }
 0x122   :  { %v327_v16 = vpop.eup %326 }
 0x123   :  { %v133_v17 = vrot.slane %v327_v16, 2 }
 0x125   :  { %313 = vmatmul.msk.f32.vlgmr.msra.gmra.mxu3 %vm78_vm2, %v133_v17 }
 0x1a8   :  { %v153_v18 = vpop.f32.mrf.mxu3 }
 0x1a9   :  { %v157_v19 = vrot.slane %v153_v18, 4 }
 0x1ab   :  { %v159_v20 = vadd.f32 %v157_v19, %v69_v9 }
 0x1ad   :  { %328 = vtanh.f32 %v159_v20 }
 0x1b3   :  { %v329_v21 = vpop.eup %328 }
 0x1b4   :  { %v162_v22 = vrot.slane %v329_v21, 4 }
 0x1b6   :  { %314 = vmatmul.msk.f32.vlgmr.msrb.gmra.mxu1 %vm78_vm2, %v162_v22 }
 0x233   :  { %v182_v24 = vpop.f32.mrf.mxu1 }
 0x234   :  { %v186_v25 = vrot.slane %v182_v24, 2 }
 0x236   :  { %v188_v26 = vadd.f32 %v186_v25, %v69_v9 }
 0x238   :  { %330 = vtanh.f32 %v188_v26 }
 0x23e   :  { %v331_v27 = vpop.eup %330 }
 0x23f   :  { %v191_v28 = vrot.slane %v331_v27, 6 }
 0x241   :  { %315 = vmatmul.msk.f32.vlgmr.msrb.gmra.mxu2 %vm78_vm2, %v191_v28 }
 0x2c4   :  { %v211_v31 = vpop.f32.mrf.mxu2 }
 0x2c5   :  { %v214_v32 = vadd.f32 %v211_v31, %v72_v30 }
 0x2c7   :  { %332 = vtanh.f32 %v214_v32 }
 0x2cd   :  { %v333_v33 = vpop.eup %332 }
 0x2ce   :  { %316 = vmatmul.msk.f32.vlgmr.msrb.gmra.mxu3 %vm78_vm2, %v333_v33 }
 0x351   :  { %v236_v34 = vpop.f32.mrf.mxu3 }
 0x352   :  { %v240_v35 = vrot.slane %v236_v34, 6 }
 0x354   :  { %v242_v36 = vadd.f32 %v240_v35, %v72_v30 }
 0x356   :  { %334 = vtanh.f32 %v242_v36 }
 0x35c   :  { %v335_v37 = vpop.eup %334 }
 0x35d   :  { %v245_v38 = vrot.slane %v335_v37, 2 }
 0x35f   :  { %317 = vmatmul.msk.f32.vlgmr.msrb.gmra.mxu0 %vm78_vm2, %v245_v38 }
 0x3dc   :  { %v265_v39 = vpop.f32.mrf.mxu0 }
 0x3dd   :  { %v269_v40 = vrot.slane %v265_v39, 4 }
 0x3df   :  { %v271_v41 = vadd.f32 %v269_v40, %v72_v30 }
 0x3e1   :  { %336 = vtanh.f32 %v271_v41 }
 0x3e7   :  { %v337_v42 = vpop.eup %336 }
 0x3e8   :  { %v274_v43 = vrot.slane %v337_v42, 4 }
 0x3ea   :  { %318 = vmatmul.msk.f32.vlgmr.msra.gmra.mxu1 %vm78_vm2, %v274_v43 }
 0x467   :  { %v294_v44 = vpop.f32.mrf.mxu1 }
 0x468   :  { %v298_v45 = vrot.slane %v294_v44, 2 }
 0x46a   :  { %v300_v46 = vadd.f32 %v298_v45, %v72_v30 }
 0x46c   :  { %338 = vtanh.f32 %v300_v46 }
 0x472   :  { %v339_v47 = vpop.eup %338 }
 0x473   :  { %303 = vst.msk [vmem:[%s426_s4 - $0x6] sm:$0xc0] %vm302_vm3, %v339_v47 }
 0x474   :  { %308 = vsyncpa [#allocation3], 1 }

</bundles_post_ra>
